<compile_context>
chip_gen: v6e
topology: v6e:2x2x1
jax: 0.10.0
libtpu: 0.0.40
codegen_flags: <defaults>
</compile_context>

<pallas_src>
import math
import functools

import jax
import jax.numpy as jnp
from jax.experimental import pallas as pl
from jax.experimental.pallas import tpu as pltpu

_LANE = 128


def _arc_linear2_kernel(x_ref, xinv_ref, w_ref, winv_ref, label_ref, o_ref, *,
                        cos_m1, sin_m1, cos_m2, sin_m2, m1, m2):
    # x_ref:     (TB, D)  matmul dtype (bf16 or f32)
    # xinv_ref:  (TB, 1)  f32  1/max(||x_b||, 1e-12)  (precomputed in wrapper)
    # w_ref:     (D, TC)  matmul dtype -- W^T tile, MXU-native, VMEM-resident
    # winv_ref:  (1, TC)  f32  1/max(||w_c||, 1e-12)  (precomputed in wrapper)
    # label_ref: (TB, 1)  i32
    # o_ref:     (TB, TC) output dtype
    x = x_ref[...]
    w = w_ref[...]

    # MXU: (TB, D) x (D, TC) -> (TB, TC) with f32 accumulation.  The weight
    # was pre-transposed once in HBM, so no in-kernel transpose is needed.
    raw = jax.lax.dot_general(
        x, w, dimension_numbers=(((1,), (0,)), ((), ())),
        preferred_element_type=jnp.float32)

    # Post-matmul normalisation: rows by 1/||x||, columns by 1/||w|| (f32).
    cosine = raw * xinv_ref[...] * winv_ref[...]

    # Clamp so rounding (|cosine| marginally > 1) cannot produce NaN.
    sine = jnp.sqrt(jnp.maximum(1.0 - cosine * cosine, 0.0))

    if m2 > 0:
        psi2 = cosine * cos_m2 + sine * sin_m2
        psi2 = jnp.where(cosine < cos_m2, psi2, -psi2 + 2.0)
    else:
        psi2 = cosine

    # Common case: no label falls inside this class tile -> output is psi2.
    o_ref[...] = psi2.astype(o_ref.dtype)

    labels = label_ref[...]                                   # (TB, 1) i32
    tc = cosine.shape[1]
    col0 = pl.program_id(0) * tc                              # class axis = grid 0
    in_tile = (labels >= col0) & (labels < col0 + tc)
    has_hit = jnp.sum(in_tile.astype(jnp.int32)) > 0

    # psi1 + one-hot select only when some label actually hits this tile.
    @pl.when(has_hit)
    def _():
        if m1 > 0:
            psi1 = cosine * cos_m1 - sine * sin_m1
            psi1 = jnp.where(cosine > -cos_m1, psi1, -psi1 - 2.0)
        else:
            psi1 = cosine
        col_ids = col0 + jax.lax.broadcasted_iota(jnp.int32, cosine.shape, 1)
        one_hot = col_ids == labels                           # GLOBAL class id
        o_ref[...] = jnp.where(one_hot, psi1, psi2).astype(o_ref.dtype)


def _vmem_budget():
    """(double-buffered working-set budget, vmem_limit_bytes) per generation."""
    try:
        cap = pltpu.get_tpu_info().vmem_capacity_bytes
    except Exception:  # conservative fallback if the query is unavailable
        cap = 64 * 1024 * 1024
    if cap >= 128 * 1024 * 1024:
        # v5e / v6e: 128 MiB physical VMEM -> big tiles, fewer grid steps.
        return 80 * 1024 * 1024, 100 * 1024 * 1024
    # v7x: 64 MiB physical VMEM -> stay conservative to avoid OOM / spills.
    return 36 * 1024 * 1024, 48 * 1024 * 1024


def _choose_tiles(B, C_pad, D, *, w_item, x_item, out_item, budget_bytes):
    """Pick (TB, TC) that divide (B, C_pad), respect the (8, 128) layout rules
    and keep the double-buffered working set under the per-chip VMEM budget."""
    TB = B
    for cand in (512, 256, 128, 64, 32, 16, 8):
        if cand <= B and B % cand == 0:
            TB = cand
            break

    def footprint(tb, tc):
        per_step = (D * tc * w_item          # resident W^T tile
                    + tb * D * x_item        # x tile
                    + tb * tc * out_item     # output tile
                    + tc * 4 + 2 * tb * 4)   # w_inv row + x_inv + labels
        return 2 * per_step                  # double buffering

    # Prefer 256-multiple class tiles (full 256x256 MXU passes on v6e/v7x),
    # else 128 (v5e MXU width / layout minimum).
    align = 256 if C_pad % 256 == 0 else _LANE
    tc = min(C_pad, 8192)
    tc -= tc % align
    tc = max(tc, align)
    while tc > align and (C_pad % tc != 0 or footprint(TB, tc) > budget_bytes):
        tc -= align
    return TB, tc


def prepare_arc_weight(weight, matmul_dtype=jnp.bfloat16):
    """One-time weight preparation (cache the result across forward calls for
    a fixed weight to avoid an extra full C*D HBM pass per call):
      * per-class inverse norms (f32),
      * transpose to (D, C) -> MXU-native tile layout, cast to matmul dtype,
      * pad the class dim to a multiple of 128 so any C tiles cleanly.
    Returns (w_t_padded, w_inv_padded, C_original)."""
    C, D = weight.shape
    w32 = weight.astype(jnp.float32)
    w_inv = 1.0 / jnp.maximum(jnp.sqrt(jnp.sum(w32 * w32, axis=1)), 1e-12)
    w_t = w32.T.astype(matmul_dtype)                          # (D, C)
    C_pad = ((C + _LANE - 1) // _LANE) * _LANE
    if C_pad != C:
        w_t = jnp.pad(w_t, ((0, 0), (0, C_pad - C)))
        w_inv = jnp.pad(w_inv, ((0, C_pad - C),))
    return w_t, w_inv.reshape(1, C_pad), C


def arc_linear2(x, weight=None, label=None, m1=0.5, m2=0.2, *,
                matmul_dtype=jnp.bfloat16, out_dtype=jnp.float32,
                tb=None, tc=None, prepared=None):
    """ArcFace forward.  x: (B, D), weight: (C, D), label: (B,) int -> (B, C).

    matmul_dtype=bf16 (default) halves the weight/x HBM streams and runs the
    MXU at native rate; pass jnp.float32 for a bit-faithful "exact" mode.
    `prepared` takes the output of prepare_arc_weight() to amortise the
    per-call weight pass."""
    if prepared is None:
        prepared = prepare_arc_weight(weight, matmul_dtype)
    w_t, w_inv, C = prepared
    D, C_pad = w_t.shape
    B, D2 = x.shape
    assert D == D2, (D, D2)

    x32 = x.astype(jnp.float32)
    # 1/||x|| precomputed once (O(B*D)) instead of once per grid step.
    x_inv = 1.0 / jnp.maximum(
        jnp.sqrt(jnp.sum(x32 * x32, axis=1, keepdims=True)), 1e-12)
    x_mm = x32.astype(matmul_dtype)
    label2d = label.reshape(B, 1).astype(jnp.int32)

    budget, vmem_limit = _vmem_budget()
    TB, TC = _choose_tiles(
        B, C_pad, D,
        w_item=jnp.dtype(matmul_dtype).itemsize,
        x_item=jnp.dtype(matmul_dtype).itemsize,
        out_item=jnp.dtype(out_dtype).itemsize,
        budget_bytes=budget)
    if tb is not None:
        TB = tb
    if tc is not None:
        TC = tc
    assert B % TB == 0 and C_pad % TC == 0, (B, C_pad, TB, TC)

    # Class tiles OUTER, batch tiles INNER: the (D, TC) weight tile is indexed
    # only by the outer grid coordinate, so Pallas keeps it VMEM-resident
    # across the inner batch loop and only x / labels / output stream.  The
    # leading "parallel" class axis lets v7x shard the weight across 2 TCs.
    grid = (C_pad // TC, B // TB)

    kernel = functools.partial(
        _arc_linear2_kernel,
        cos_m1=math.cos(m1), sin_m1=math.sin(m1),
        cos_m2=math.cos(m2), sin_m2=math.sin(m2),
        m1=m1, m2=m2)

    out = pl.pallas_call(
        kernel,
        out_shape=jax.ShapeDtypeStruct((B, C_pad), out_dtype),
        grid=grid,
        in_specs=[
            pl.BlockSpec((TB, D), lambda j, i: (i, 0)),    # x tile
            pl.BlockSpec((TB, 1), lambda j, i: (i, 0)),    # 1/||x|| column
            pl.BlockSpec((D, TC), lambda j, i: (0, j)),    # W^T tile (resident)
            pl.BlockSpec((1, TC), lambda j, i: (0, j)),    # 1/||w|| row
            pl.BlockSpec((TB, 1), lambda j, i: (i, 0)),    # labels
        ],
        out_specs=pl.BlockSpec((TB, TC), lambda j, i: (i, j)),
        compiler_params=pltpu.CompilerParams(
            dimension_semantics=("parallel", "parallel"),
            vmem_limit_bytes=vmem_limit),
    )(x_mm, x_inv, w_t, w_inv, label2d)

    if C_pad != C:
        out = out[:, :C]
    return out


def _reference(x, weight, label, m1=0.5, m2=0.2):
    # Pure-JAX reference matching the PyTorch forward.
    xn = x / jnp.maximum(jnp.linalg.norm(x, axis=1, keepdims=True), 1e-12)
    wn = weight / jnp.maximum(jnp.linalg.norm(weight, axis=1, keepdims=True), 1e-12)
    cosine = xn @ wn.T
    sine = jnp.sqrt(1.0 - cosine ** 2)
    psi1 = cosine * math.cos(m1) - sine * math.sin(m1)
    psi1 = jnp.where(cosine > -math.cos(m1), psi1, -psi1 - 2.0)
    psi2 = cosine * math.cos(m2) + sine * math.sin(m2)
    psi2 = jnp.where(cosine < math.cos(m2), psi2, -psi2 + 2.0)
    one_hot = jax.nn.one_hot(label, cosine.shape[1], dtype=cosine.dtype)
    return one_hot * psi1 + (1 - one_hot) * psi2


if __name__ == "__main__":
    B, D, C = 16, 128, 512   # batch, in_features, out_features (small demo)

    key = jax.random.PRNGKey(0)
    kx, kw, kl = jax.random.split(key, 3)

    x = jax.random.normal(kx, (B, D), dtype=jnp.float32)

    # Deterministic xavier_uniform_-style init for weight (out, in).
    bound = math.sqrt(6.0 / (D + C))
    weight = jax.random.uniform(kw, (C, D), minval=-bound, maxval=bound,
                                dtype=jnp.float32)
    label = jax.random.randint(kl, (B,), 0, C, dtype=jnp.int32)

    ref = _reference(x, weight, label)

    # 1) f32 "exact" mode, forced small tiles -> a real multi-tile (4 x 2)
    #    grid exercising the class-outer/batch-inner order + global one-hot.
    out_f32 = arc_linear2(x, weight, label, matmul_dtype=jnp.float32,
                          tb=8, tc=128)
    out_f32 = jax.block_until_ready(out_f32)
    assert out_f32.shape == (B, C)
    assert jnp.allclose(out_f32, ref, atol=1e-5, rtol=1e-5), "f32 mismatch"

    # 2) default bf16-matmul mode (native MXU rate, half the weight traffic);
    #    cosine carries ~bf16 precision, so compare loosely.
    out_bf16 = arc_linear2(x, weight, label, tb=8, tc=256)
    out_bf16 = jax.block_until_ready(out_bf16)
    assert out_bf16.shape == (B, C)
    assert jnp.allclose(out_bf16, ref, atol=5e-2, rtol=0.0), "bf16 mismatch"

    # 3) class count that is not a multiple of 128 -> padded to 256 and
    #    sliced back (replaces the old single-full-C-tile fallback).
    C2 = 200
    w2 = jax.random.uniform(kw, (C2, D), minval=-bound, maxval=bound,
                            dtype=jnp.float32)
    l2 = jax.random.randint(kl, (B,), 0, C2, dtype=jnp.int32)
    out_pad = arc_linear2(x, w2, l2, matmul_dtype=jnp.float32)
    out_pad = jax.block_until_ready(out_pad)
    ref2 = _reference(x, w2, l2)
    assert out_pad.shape == (B, C2)
    assert jnp.allclose(out_pad, ref2, atol=1e-5, rtol=1e-5), "pad mismatch"

    print("KERNEL_OK")
</pallas_src>

<mosaic_0001>
module attributes {stable_mosaic.version = 11 : i64} {
  func.func @_arc_linear2_kernel(%arg0: i32, %arg1: i32, %arg2: memref<8x128xf32, #tpu.memory_space<vmem>>, %arg3: memref<8x1xf32, #tpu.memory_space<vmem>>, %arg4: memref<128x128xf32, #tpu.memory_space<vmem>>, %arg5: memref<1x128xf32, #tpu.memory_space<vmem>>, %arg6: memref<8x1xi32, #tpu.memory_space<vmem>>, %arg7: memref<8x128xf32, #tpu.memory_space<vmem>>) attributes {dimension_semantics = [#tpu.dimension_semantics<parallel>, #tpu.dimension_semantics<parallel>], iteration_bounds = array<i64: 4, 2>, scalar_prefetch = 0 : i64, scratch_operands = 0 : i64, tpu.core_type = #tpu.core_type<tc>, window_params = [{transform_indices = @transform_0, window_bounds = array<i64: 8, 128>}, {transform_indices = @transform_1, window_bounds = array<i64: 8, 1>}, {transform_indices = @transform_2, window_bounds = array<i64: 128, 128>}, {transform_indices = @transform_3, window_bounds = array<i64: 1, 128>}, {transform_indices = @transform_4, window_bounds = array<i64: 8, 1>}, {transform_indices = @transform_5, window_bounds = array<i64: 8, 128>}]} {
    %c0 = arith.constant 0 : index
    %c0_0 = arith.constant 0 : index
    %0 = vector.load %arg2[%c0, %c0_0] : memref<8x128xf32, #tpu.memory_space<vmem>>, vector<8x128xf32>
    %c0_1 = arith.constant 0 : index
    %c0_2 = arith.constant 0 : index
    %1 = vector.load %arg4[%c0_1, %c0_2] : memref<128x128xf32, #tpu.memory_space<vmem>>, vector<128x128xf32>
    %cst = arith.constant dense<0.000000e+00> : vector<8x128xf32>
    %2 = tpu.matmul %0, %1, %cst {dimension_numbers = #tpu.dot_dimension_numbers<[1], [0], [0], [1], [0, 0, 1, 1], [], []>} : vector<8x128xf32>, vector<128x128xf32>, vector<8x128xf32> -> vector<8x128xf32>
    %c0_3 = arith.constant 0 : index
    %c0_4 = arith.constant 0 : index
    %3 = vector.load %arg3[%c0_3, %c0_4] : memref<8x1xf32, #tpu.memory_space<vmem>>, vector<8x1xf32>
    %4 = vector.broadcast %3 : vector<8x1xf32> to vector<8x128xf32>
    %5 = arith.mulf %2, %4 : vector<8x128xf32>
    %c0_5 = arith.constant 0 : index
    %c0_6 = arith.constant 0 : index
    %6 = vector.load %arg5[%c0_5, %c0_6] : memref<1x128xf32, #tpu.memory_space<vmem>>, vector<1x128xf32>
    %7 = vector.broadcast %6 : vector<1x128xf32> to vector<8x128xf32>
    %8 = arith.mulf %5, %7 : vector<8x128xf32>
    %9 = arith.mulf %8, %8 : vector<8x128xf32>
    %cst_7 = arith.constant 1.000000e+00 : f32
    %10 = vector.broadcast %cst_7 : f32 to vector<8x128xf32>
    %11 = arith.subf %10, %9 : vector<8x128xf32>
    %cst_8 = arith.constant 0.000000e+00 : f32
    %12 = vector.broadcast %cst_8 : f32 to vector<8x128xf32>
    %13 = arith.maximumf %11, %12 : vector<8x128xf32>
    %14 = math.sqrt %13 : vector<8x128xf32>
    %cst_9 = arith.constant 0.980066597 : f32
    %15 = vector.broadcast %cst_9 : f32 to vector<8x128xf32>
    %16 = arith.mulf %8, %15 : vector<8x128xf32>
    %cst_10 = arith.constant 0.198669329 : f32
    %17 = vector.broadcast %cst_10 : f32 to vector<8x128xf32>
    %18 = arith.mulf %14, %17 : vector<8x128xf32>
    %19 = arith.addf %16, %18 : vector<8x128xf32>
    %cst_11 = arith.constant 0.980066597 : f32
    %20 = vector.broadcast %cst_11 : f32 to vector<8x128xf32>
    %21 = arith.cmpf olt, %8, %20 : vector<8x128xf32>
    %cst_12 = arith.constant 0.000000e+00 : f32
    %22 = vector.broadcast %cst_12 : f32 to vector<8x128xf32>
    %23 = arith.subf %22, %19 : vector<8x128xf32>
    %cst_13 = arith.constant 2.000000e+00 : f32
    %24 = vector.broadcast %cst_13 : f32 to vector<8x128xf32>
    %25 = arith.addf %23, %24 : vector<8x128xf32>
    %26 = arith.select %21, %19, %25 : vector<8x128xi1>, vector<8x128xf32>
    %c0_14 = arith.constant 0 : index
    %c0_15 = arith.constant 0 : index
    %27 = vector.load %arg7[%c0_14, %c0_15] : memref<8x128xf32, #tpu.memory_space<vmem>>, vector<8x128xf32>
    tpu.vector_store %arg7[%c0_14, %c0_15], %26 {strides = array<i32>} : memref<8x128xf32, #tpu.memory_space<vmem>>, vector<8x128xf32>,
    %c0_16 = arith.constant 0 : index
    %c0_17 = arith.constant 0 : index
    %28 = vector.load %arg6[%c0_16, %c0_17] : memref<8x1xi32, #tpu.memory_space<vmem>>, vector<8x1xi32>
    %c128_i32 = arith.constant 128 : i32
    %29 = arith.muli %arg0, %c128_i32 : i32
    %30 = vector.broadcast %29 : i32 to vector<8x1xi32>
    %31 = arith.cmpi sge, %28, %30 : vector<8x1xi32>
    %c128_i32_18 = arith.constant 128 : i32
    %32 = arith.addi %29, %c128_i32_18 : i32
    %33 = vector.broadcast %32 : i32 to vector<8x1xi32>
    %34 = arith.cmpi slt, %28, %33 : vector<8x1xi32>
    %35 = arith.andi %31, %34 : vector<8x1xi1>
    %36 = arith.extui %35 : vector<8x1xi1> to vector<8x1xi32>
    %37 = vector.shape_cast %36 : vector<8x1xi32> to vector<1x8x1xi32>
    %cst_19 = arith.constant dense<0> : vector<1xi32>
    %38 = vector.multi_reduction <add>, %37, %cst_19 [1, 2] : vector<1x8x1xi32> to vector<1xi32>
    %39 = vector.shape_cast %38 : vector<1xi32> to vector<1x1x1xi32>
    %40 = vector.extract %39[0, 0, 0] : i32 from vector<1x1x1xi32>
    %c0_i32 = arith.constant 0 : i32
    %41 = arith.cmpi sgt, %40, %c0_i32 : i32
    %42 = arith.extui %41 : i1 to i32
    %c0_i32_20 = arith.constant 0 : i32
    %43 = arith.cmpi ne, %42, %c0_i32_20 : i32
    scf.if %43 {
      %cst_21 = arith.constant 0.87758255 : f32
      %44 = vector.broadcast %cst_21 : f32 to vector<8x128xf32>
      %45 = arith.mulf %8, %44 : vector<8x128xf32>
      %cst_22 = arith.constant 0.47942555 : f32
      %46 = vector.broadcast %cst_22 : f32 to vector<8x128xf32>
      %47 = arith.mulf %14, %46 : vector<8x128xf32>
      %48 = arith.subf %45, %47 : vector<8x128xf32>
      %cst_23 = arith.constant -0.87758255 : f32
      %49 = vector.broadcast %cst_23 : f32 to vector<8x128xf32>
      %50 = arith.cmpf ogt, %8, %49 : vector<8x128xf32>
      %cst_24 = arith.constant 0.000000e+00 : f32
      %51 = vector.broadcast %cst_24 : f32 to vector<8x128xf32>
      %52 = arith.subf %51, %48 : vector<8x128xf32>
      %cst_25 = arith.constant 2.000000e+00 : f32
      %53 = vector.broadcast %cst_25 : f32 to vector<8x128xf32>
      %54 = arith.subf %52, %53 : vector<8x128xf32>
      %55 = arith.select %50, %48, %54 : vector<8x128xi1>, vector<8x128xf32>
      %56 = tpu.iota {dimensions = array<i32: 1>} : vector<8x128xi32>
      %57 = vector.broadcast %29 : i32 to vector<8x128xi32>
      %58 = arith.addi %57, %56 : vector<8x128xi32>
      %59 = vector.broadcast %28 : vector<8x1xi32> to vector<8x128xi32>
      %60 = arith.cmpi eq, %58, %59 : vector<8x128xi32>
      %61 = arith.select %60, %55, %26 : vector<8x128xi1>, vector<8x128xf32>
      %c0_26 = arith.constant 0 : index
      %c0_27 = arith.constant 0 : index
      %62 = vector.load %arg7[%c0_26, %c0_27] : memref<8x128xf32, #tpu.memory_space<vmem>>, vector<8x128xf32>
      tpu.vector_store %arg7[%c0_26, %c0_27], %61 {strides = array<i32>} : memref<8x128xf32, #tpu.memory_space<vmem>>, vector<8x128xf32>,
    } else {
    }
    return
  }
  func.func @transform_0(%arg0: i32, %arg1: i32) -> (i32, i32) {
    %c0_i32 = arith.constant 0 : i32
    %c0_i32_0 = arith.constant 0 : i32
    return %arg1, %c0_i32 : i32, i32
  }
  func.func @transform_1(%arg0: i32, %arg1: i32) -> (i32, i32) {
    %c0_i32 = arith.constant 0 : i32
    %c0_i32_0 = arith.constant 0 : i32
    return %arg1, %c0_i32 : i32, i32
  }
  func.func @transform_2(%arg0: i32, %arg1: i32) -> (i32, i32) {
    %c0_i32 = arith.constant 0 : i32
    %c0_i32_0 = arith.constant 0 : i32
    return %c0_i32, %arg0 : i32, i32
  }
  func.func @transform_3(%arg0: i32, %arg1: i32) -> (i32, i32) {
    %c0_i32 = arith.constant 0 : i32
    %c0_i32_0 = arith.constant 0 : i32
    return %c0_i32, %arg0 : i32, i32
  }
  func.func @transform_4(%arg0: i32, %arg1: i32) -> (i32, i32) {
    %c0_i32 = arith.constant 0 : i32
    %c0_i32_0 = arith.constant 0 : i32
    return %arg1, %c0_i32 : i32, i32
  }
  func.func @transform_5(%arg0: i32, %arg1: i32) -> (i32, i32) {
    %c0_i32 = arith.constant 0 : i32
    return %arg1, %arg0 : i32, i32
  }
}

</mosaic_0001>

<bundles_post_ra>
// kernel: tpu_custom_call.1
= control target key start
LH: loop header
LB: loop body
LE: loop exit
PB: predicated region body
PF: predicated region fallthrough
CT: control target
= control target key end

     0   :  { %s1262_s0 = inlined_call_operand.vmem [shape: f32[16,128], index: 0, kind: input, shape index: {}]   ;;  %s1263_s1 = inlined_call_operand.vmem [shape: f32[16,1], index: 1, kind: input, shape index: {}]   ;;  %s1264_s2 = inlined_call_operand.hbm [shape: f32[128,512], index: 2, kind: input, shape index: {}]   ;;  %s1265_s3 = inlined_call_operand.vmem [shape: f32[1,512], index: 3, kind: input, shape index: {}]   ;;  %s1266_s4 = inlined_call_operand.vmem [shape: s32[16,1], index: 4, kind: input, shape index: {}]   ;;  %s1267_s5 = inlined_call_operand.hbm [shape: f32[16,512], index: 5, kind: output, shape index: {}]  }
   0x1   :  { %1273 = sst [smem:[#allocation13_spill]] %s1267_s5 }
   0x2   :  { %10 = vsyncpa [#allocation3], 0 }
   0x3   :  { %12 = vsyncpa [#allocation3 + $0x1], 0 }
   0x4   :  { %13 = vsyncpa [#allocation4], 0 }
   0x5   :  { %15 = vsyncpa [#allocation4 + $0x1], 0  ;;  %s1013_s18 = smov 0   ;;  %s1015_s19 = smov 0  }
   0x6   :  { %s1017_s20 = smov 0   ;;  %s1019_s21 = smov 0  }
   0x7   :  { %s1021_s22 = smov 0   ;;  %s1023_s23 = smov 0  }
   0x8   :  { %s1025_s24 = smov 0   ;;  %s1027_s25 = smov 0  }
   0x9   :  { %s1029_s26 = smov 0   ;;  %s1031_s27 = smov 0  }
   0xa   :  { %s1033_s28 = smov 0  }
   0xb LB: > { %1274 = sst [smem:[#allocation8_spill]] %s964_s26  ;;  %s635_s29 = sadd.s32 4294967295, %s972_s28   ;;  %s972_s28 = sphi %s1033_s28, %s21_s28   ;;  %s968_s27 = sphi %s1031_s27, %s1289_s27   ;;  %s964_s26 = sphi %s1029_s26, %s1288_s26   ;;  %s960_s25 = sphi %s1027_s25, %s1287_s25   ;;  %s956_s24 = sphi %s1025_s24, %s1286_s24   ;;  %s952_s23 = sphi %s1023_s23, %s1295_s23   ;;  %s948_s22 = sphi %s1021_s22, %s1294_s22   ;;  %s944_s21 = sphi %s1019_s21, %s1293_s21   ;;  %s940_s20 = sphi %s1017_s20, %s1292_s20   ;;  %s936_s19 = sphi %s1015_s19, %s1291_s19   ;;  %s932_s18 = sphi %s1013_s18, %s1290_s18  }
   0xc   : > { %1275 = sst [smem:[#allocation9_spill]] %s968_s27  ;;  %s636_s30 = sadd.s32 4294967294, %s972_s28  }
   0xd   : > { %s30_s6 = sadd.s32 1, %s964_s26  ;;  %s33_s7 = sadd.s32 1, %s968_s27 }
   0xe   : > { %p31_p0 = scmp.ge.s32.totalorder %s30_s6, 2  ;;  %s92_s8 = sadd.s32 1, %s952_s23 }
   0xf   : > { %p99_p1 = scmp.ne.s32.totalorder %s952_s23, %s948_s22  ;;  %p100_p2 = scmp.eq.s32.totalorder %s972_s28, 0 }
  0x10   : > { %s1297_s6 = smov (%p31_p0, %s30_s6), 0  ;;  %s1299_s7 = smov (!%p31_p0, %s33_s7), %s968_s27 }
  0x11   : > { %1276 = sst [smem:[#allocation10_spill]] %s1297_s6  ;;  %p1077_p3 = por %p100_p2, %p99_p1 }
  0x12   : > { %p105_p4 = scmp.ne.s32.totalorder %s948_s22, %s944_s21  ;;  %p35_p5 = scmp.ge.s32.totalorder %s1299_s7, 4 }
  0x13   : > { %p106_p6 = scmp.eq.s32.totalorder %s635_s29, 0  ;;  %s167_s10 = ssub.s32 %s964_s26, %s1297_s6 }
  0x14   : > { %s172_s11 = sadd.s32 1, %s940_s20  ;;  %s1301_s7 = smov (%p35_p5, %s1299_s7), 0 }
  0x15   : > { %1278 = sst [smem:[#allocation11_spill]] %s1301_s7  ;;  %p1087_p7 = por %p106_p6, %p105_p4 }
  0x16   : > { %p182_p8 = scmp.ne.s32.totalorder %s940_s20, %s936_s19  ;;  %s89_s13 = ssub.s32 %s968_s27, %s1301_s7 }
  0x17   : > { %p183_p9 = scmp.eq.s32.totalorder %s635_s29, 7  ;;  %p90_p10 = scmp.eq.s32.totalorder %s89_s13, 0 }
  0x18   : > { %s169_s14 = sor.u32 %s167_s10, %s89_s13  ;;  %p188_p13 = scmp.ne.s32.totalorder %s936_s19, %s932_s18 }
  0x19   : > { %p170_p11 = scmp.eq.s32.totalorder %s169_s14, 0  ;;  %p1095_p12 = por %p183_p9, %p182_p8 }
  0x1a   : > { %s1100_s16 = scalar_select %p90_p10, %s952_s23, %s92_s8  }
  0x1b   : > { %s1103_s17 = scalar_select %p170_p11, %s940_s20, %s172_s11  }
  0x1c   : > { %1281 = sst [smem:[#allocation12_spill]] %s1100_s16  ;;  %p189_p0 = scmp.eq.s32.totalorder %s636_s30, 7 }
  0x1d   : > { %p722_p1 = scmp.lt.s32.totalorder %s972_s28, 8  ;;  %s223_s29 = sand.u32 1, %s952_s23  }
  0x1e   : > { %p1108_p2 = por %p189_p0, %p188_p13  ;;  %s639_s7 = sshll.u32 %s223_s29, 7 }
  0x1f   : > { %s640_s10 = sshll.u32 %s968_s27, 7  ;;  %s227_s26 = scalar_lea.vmem [#allocation2], %s639_s7 }
  0x20   : > { %s232_s6 = scalar_lea.hbm %s1264_s2, %s640_s10  ;;  %s233_s5 = sshll.u32 %s227_s26, 4  ;;  %s234_s5 = int_to_ptr.vmem [resolvable:$true] %s233_s5 }
  0x21   : > { %p1119_p4 = pnand %p722_p1, %p1077_p3  ;;  %s224_s30 = scalar_lea.sflag [#allocation3], %s223_s29 }
  0x22   : > { %s837_s11 = scalar_lea.vmem %s234_s5, 2048  ;;  %s974_s27 = smov [#allocation2]  }
  0x23   : > { %p826_p5 = pneg %p1119_p4  ;;  %p838_p6 = scmp.ne.s32.totalorder %s234_s5, %s837_s11 }
  0x24   : > { %s842_s16 = sshll.u32 %s974_s27, 4  ;;  %s843_s16 = int_to_ptr.vmem [resolvable:$false] %s842_s16 }
  0x25   : > { %p840_p8 = pnand %p838_p6, %p826_p5  ;;  %s844_s10 = scalar_lea.vmem %s843_s16, 4096 }
  0x26   : > { %p845_p10 = scmp.lt.s32.totalorder %s234_s5, %s843_s16  ;;  %p846_p11 = scmp.lt.s32.totalorder %s844_s10, %s837_s11 }
  0x27   : > { %p841_p9 = pneg %p840_p8 }
  0x28   : > { %p847_p13 = por %p846_p11, %p845_p10 }
  0x2a   : > { %p848_p0 = pnand %p847_p13, %p841_p9 }
  0x2c   : > { %851 = shalt.err (!%p848_p0)
}
  0x2d   : > { %s975_s26 = smov 512   ;;  %s976_s7 = smov 128  }
  0x2e   : > { %s977_s9 = smov 8   ;;  %p641_p3 = scmp.ge.s32.totalorder %s972_s28, 1 }
  0x2f   : > { %717 = dma.hbm_to_vmem [thread:$0]  (!%p1119_p4), %s232_s6, 2048, %s234_s5, %s224_s30, %s975_s26, %s976_s7, %s977_s9  }
  0x30   : > { %p254_p1 = scmp.lt.s32.totalorder %s972_s28, 9 }
  0x32   : > { %p255_p5 = pnand %p641_p3, %p254_p1 }
  0x33   : > { %s260_s27 = sand.u32 (!%p255_p5), 1, %s948_s22  }
  0x34   : > { %258 = sbr.rel (%p255_p5) target bundleno = 476 (0x1dc), region = 40  ;;  %s642_s16 = sshll.u32 (!%p255_p5), %s260_s27, 7 }
  0x35   : > { %s261_s29 = scalar_lea.sflag (!%p255_p5), [#allocation3], %s260_s27  ;;  %s1130_s13 = scalar_lea.vmem (!%p255_p5), [#allocation2], %s642_s16 }
  0x39   : > { %923 = dma.done.wait (%p1087_p7), %s261_s29, 2048  }
  0x3a   : > { %925 = vsyncadd (%p1087_p7), %s261_s29, 4294965248  ;;  %p306_p4 = scmp.lt.s32.totalorder %s956_s24, 1  ;;  %v978_v0 = vmov 0.0   ;;  %vm979_vm0 = vmmov 0   ;;  %v980_v1 = vmov 0   ;;  %s648_s5 = sshll.u32 %s960_s25, 7 }
  0x3b   : > { %673 = vmatprep.subr.mxu0 %v978_v0  ;;  %705 = vmatprep.mubr.msk.f32.mxu0 %vm979_vm0, %v978_v0  ;;  %v337_v2 = vld [vmem:[%s1130_s13 + $0x78] sm:$0xff]  ;;  %v336_v3 = vld [vmem:[%s1130_s13 + $0x70] sm:$0xff]  ;;  %s445_s12 = sadd.s32 128, %s648_s5  ;;  %v335_v4 = vld [vmem:[%s1130_s13 + $0x68] sm:$0xff]  ;;  %v1151_v5 = vstv %s648_s5  ;;  %vm450_vm3 = vcmask 7168   ;;  %p314_p7 = scmp.lt.s32.totalorder %s960_s25, 3 }
  0x3c   : > { %819 = vset.pattern.permute.xlu1 %v980_v1  ;;  %820 = vset.pattern.permute.xlu0 %v980_v1  ;;  %s307_s6 = scalar_select %p306_p4, %s956_s24, 1  ;;  %v446_v6 = vstv %s445_s12  ;;  %v334_v7 = vld [vmem:[%s1130_s13 + $0x60] sm:$0xff]  ;;  %v333_v9 = vld [vmem:[%s1130_s13 + $0x58] sm:$0xff]  ;;  %v332_v11 = vld [vmem:[%s1130_s13 + $0x50] sm:$0xff] }
  0x3d   : > { %674 = vmatpush3.msra.mxu0 %v337_v2  ;;  %v331_v14 = vld [vmem:[%s1130_s13 + $0x48] sm:$0xff]  ;;  %v330_v17 = vld [vmem:[%s1130_s13 + $0x40] sm:$0xff]  ;;  %v329_v19 = vld [vmem:[%s1130_s13 + $0x38] sm:$0xff]  ;;  %s315_s29 = scalar_select %p314_p7, %s960_s25, 3 }
  0x3e   : > { %s1143_s14 = sshll.u32 %s307_s6, 3  ;;  %675 = vmatprep.subr.mxu0 %v978_v0  ;;  %v328_v21 = vld [vmem:[%s1130_s13 + $0x30] sm:$0xff]  ;;  %v327_v22 = vld [vmem:[%s1130_s13 + $0x28] sm:$0xff]  ;;  %v326_v23 = vld [vmem:[%s1130_s13 + $0x20] sm:$0xff] }
  0x3f   : > { %s320_s11 = scalar_lea.vmem %s1266_s4, %s1143_s14  ;;  %676 = vmatpush3.msra.mxu0 %v336_v3  ;;  %s313_s7 = scalar_lea.vmem %s1263_s1, %s1143_s14  ;;  %v325_v24 = vld [vmem:[%s1130_s13 + $0x18] sm:$0xff]  ;;  %v324_v25 = vld [vmem:[%s1130_s13 + $0x10] sm:$0xff]  ;;  %v323_v26 = vld [vmem:[%s1130_s13 + $0x8] sm:$0xff] }
  0x40   : > { %677 = vmatprep.subr.mxu0 %v978_v0  ;;  %v1159_v8 = vld [vmem:[%s320_s11] sm:$0xff]  ;;  %s309_s16 = scalar_lea.vmem %s1262_s0, %s1143_s14  ;;  %s316_s6 = scalar_lea.vmem %s1265_s3, %s315_s29 }
  0x41   : > { %678 = vmatpush3.msra.mxu0 %v335_v4  ;;  %vm444_vm1 = vcmp.ge.s32.totalorder %v1159_v8, %v1151_v5  ;;  %vm447_vm2 = vcmp.lt.s32.totalorder %v1159_v8, %v446_v6  ;;  %v408_v10 = vld [vmem:[%s313_s7] sm:$0xff]  ;;  %s303_s14 = sand.u32 1, %s936_s19  }
  0x42   : > { %679 = vmatprep.subr.mxu0 %v978_v0  ;;  %vm448_vm4 = vmand %vm444_vm1, %vm447_vm2  ;;  %411 = vperm.xlu1 %819, %v408_v10   ;;  %v322_v27 = vld [vmem:[%s1130_s13] sm:$0xff]  ;;  %s643_s8 = sshll.u32 %s303_s14, 3 }
  0x43   : > { %680 = vmatpush3.msra.mxu0 %v334_v7  ;;  %v449_v12 = vsel %vm448_vm4, 1, %v980_v1  ;;  %v321_v28 = vld [vmem:[%s309_s16] sm:$0xff]  ;;  %s305_s30 = scalar_lea.vmem [#allocation5], %s643_s8 }
  0x44   : > { %681 = vmatprep.subr.mxu0 %v978_v0  ;;  %v451_v13 = vsel %vm450_vm3, %v449_v12, 0  ;;  %v647_v43 = vld [vmem:[%s316_s6] ss:$0 sm:$0xff] }
  0x45   : > { %682 = vmatpush3.msra.mxu0 %v333_v9  ;;  %v453_v15 = vshrl.u32 %v451_v13, 16  ;;  %v452_v16 = vand.u32 65535, %v451_v13 }
  0x46   : > { %683 = vmatprep.subr.mxu0 %v978_v0 }
  0x47   : > { %684 = vmatpush3.msra.mxu0 %v332_v11  ;;  %v455_v18 = vcvt.s32.f32 %v453_v15  ;;  %v454_v20 = vcvt.s32.f32 %v452_v16 }
  0x48   : > { %685 = vmatprep.subr.mxu0 %v978_v0 }
  0x49   : > { %686 = vmatpush3.msra.mxu0 %v331_v14  ;;  %458 = vadd.xlane.f32.xlu0 %v455_v18 }
  0x4a   : > { %687 = vmatprep.subr.mxu0 %v978_v0 }
  0x4b   : > { %688 = vmatpush3.msra.mxu0 %v330_v17 }
  0x4c   : > { %689 = vmatprep.subr.mxu0 %v978_v0 }
  0x4d   : > { %690 = vmatpush3.msra.mxu0 %v329_v19  ;;  %456 = vadd.xlane.f32.xlu0 %v454_v20 }
  0x4e   : > { %691 = vmatprep.subr.mxu0 %v978_v0 }
  0x4f   : > { %692 = vmatpush3.msra.mxu0 %v328_v21 }
  0x50   : > { %693 = vmatprep.subr.mxu0 %v978_v0 }
  0x51   : > { %694 = vmatpush3.msra.mxu0 %v327_v22 }
  0x52   : > { %695 = vmatprep.subr.mxu0 %v978_v0 }
  0x53   : > { %696 = vmatpush3.msra.mxu0 %v326_v23 }
  0x54   : > { %697 = vmatprep.subr.mxu0 %v978_v0 }
  0x55   : > { %698 = vmatpush3.msra.mxu0 %v325_v24 }
  0x56   : > { %699 = vmatprep.subr.mxu0 %v978_v0 }
  0x57   : > { %700 = vmatpush3.msra.mxu0 %v324_v25 }
  0x58   : > { %701 = vmatprep.subr.mxu0 %v978_v0 }
  0x59   : > { %702 = vmatpush3.msra.mxu0 %v323_v26 }
  0x5a   : > { %703 = vmatprep.subr.mxu0 %v978_v0 }
  0x5b   : > { %704 = vmatpush3.msra.mxu0 %v322_v27 }
  0x5c   : > { %706 = vmatmul.mubr.f32.vlgmr.msra.gmra.mxu0 %v321_v28 }
  0xbd   : > { %v412_v41 = vpop.permute.xlu1 %411 }
  0xd2   : > { %v459_v29 = vpop.xlane.xlu0 %458 }
  0xd3   : > { %v461_v30 = vcvt.f32.s32 %v459_v29 }
  0xd5   : > { %v462_v31 = vshll.u32 %v461_v30, 16 }
  0xd6   : > { %v457_v32 = vpop.xlane.xlu0 %456 }
  0xd7   : > { %v460_v33 = vcvt.f32.s32 %v457_v32 }
  0xd9   : > { %v463_v34 = vadd.s32 %v462_v31, %v460_v33 }
  0xdb   : > { %v464_v35 = vrot.slane %v463_v34, 4 }
  0xdd   : > { %v465_v36 = vadd.s32 %v464_v35, %v463_v34 }
  0xdf   : > { %v466_v37 = vrot.slane %v465_v36, 2 }
  0xe1   : > { %v467_v38 = vadd.s32 %v466_v37, %v465_v36 }
  0xe3   : > { %v468_v39 = vrot.slane %v467_v38, 1 }
  0xe5   : > { %v469_v40 = vadd.s32 %v468_v39, %v467_v38 }
  0xe7   : > { %708 = vpush %v469_v40 }
 0x118   : > { %s1198_s12 = spop %708 }
 0x119   : > { %p649_p6 = scmp.le.s32.totalorder %s1198_s12, 0 }
 0x11c   : > { %v404_v42 = vpop.f32.mrf.mxu0 }
 0x11d   : > { %v414_v44 = vmul.f32 %v412_v41, %v404_v42 }
 0x11e   : > { %v707_v45 = vpop.f32.mrf.mxu0 }
 0x11f   : > { %v422_v46 = vmul.f32 %v647_v43, %v414_v44 }
 0x121   : > { %v423_v47 = vmul.f32 %v422_v46, %v422_v46  ;;  %v433_v55 = vmul.f32 0.9800666, %v422_v46  ;;  %vm436_vm7 = vcmp.lt.f32.partialorder %v422_v46, 0.9800666 }
 0x123   : > { %v424_v48 = vsub.f32 1.0, %v423_v47 }
 0x125   : > { %v425_v49 = vmax.f32 %v424_v48, 0.0 }
 0x127   : > { %821 = vrsqrt.f32 %v425_v49  ;;  %vm428_vm5 = vcmp.eq.f32.partialorder %v425_v49, inf  ;;  %v431_v52 = vand.u32 2147483648, %v425_v49  ;;  %vm430_vm6 = vcmp.eq.f32.partialorder %v425_v49, 0.0 }
 0x134   : > { %v822_v50 = vpop.eup %821 }
 0x135   : > { %v427_v51 = vmul.f32 %v822_v50, %v425_v49 }
 0x137   : > { %v429_v53 = vsel %vm428_vm5, %v425_v49, %v427_v51 }
 0x138   : > { %v432_v54 = vsel %vm430_vm6, %v431_v52, %v429_v53 }
 0x139   : > { %v434_v56 = vmul.f32 0.19866933, %v432_v54 }
 0x13b   : > { %v435_v57 = vadd.f32 %v434_v56, %v433_v55 }
 0x13d   : > { %v437_v58 = vsub.f32 0.0, %v435_v57 }
 0x13e   : > { %474 = sbr.rel (%p649_p6) target bundleno = 452 (0x1c4), region = 48 }
 0x13f   : > { %v438_v59 = vadd.f32 2.0, %v437_v58 }
 0x141   : > { %v439_v60 = vsel %vm436_vm7, %v435_v57, %v438_v59 }
 0x142   : > { %440 = vst [vmem:[%s305_s30] sm:$0xff] %v439_v60 }
 0x143   : > { %v981_v61 = vmov 0   ;;  %v475_v62 = vmul.f32 0.87758255, %v422_v46  ;;  %v476_v63 = vmul.f32 0.47942555, %v432_v54  ;;  %v482_v1 = vlaneseq }
 0x144   : > { %823 = vset.pattern.permute.xlu0 %v981_v61  ;;  %vm478_vm8 = vcmp.gt.f32.partialorder %v422_v46, -0.87758255 }
 0x145   : > { %486 = vperm.xlu0 %823, %v1159_v8   ;;  %v477_v0 = vsub.f32 %v475_v62, %v476_v63  ;;  %v483_v3 = vand.u32 127, %v482_v1 }
 0x147   : > { %v479_v2 = vsub.f32 0.0, %v477_v0  ;;  %v484_v6 = vadd.s32 %v483_v3, %v1151_v5 }
 0x149   : > { %v650_v4 = vadd.f32 -2.0, %v479_v2 }
 0x14b   : > { %v481_v7 = vsel %vm478_vm8, %v477_v0, %v650_v4 }
 0x1c0   : > { %v487_v9 = vpop.permute.xlu0 %486 }
 0x1c1   : > { %vm488_vm9 = vcmp.eq.s32.totalorder %v484_v6, %v487_v9 }
 0x1c2   : > { %v489_v10 = vsel %vm488_vm9, %v481_v7, %v439_v60 }
 0x1c3   : > { %490 = vst [vmem:[%s305_s30] sm:$0xff] %v489_v10 }
 0x1c4 PF: > { %s652_s11 = sshll.u32 %s956_s24, 2  ;;  %s507_s26 = sshll.u32 %s305_s30, 4  ;;  %s508_s26 = int_to_ptr.vmem [resolvable:$true] %s507_s26 }
 0x1c5   : > { %s503_s10 = sadd.s32 %s960_s25, %s652_s11  ;;  %s1284_s16 = sld [smem:[#allocation13_spill]] }
 0x1c6   : > { %s653_s7 = sshll.u32 %s503_s10, 7  ;;  %s492_s13 = scalar_lea.sflag [#allocation4], %s303_s14 }
 0x1c7   : > { %s852_s5 = scalar_lea.vmem %s508_s26, 128  ;;  %s982_s6 = smov [#allocation5]  }
 0x1c8   : > { %p853_p8 = scmp.ne.s32.totalorder %s508_s26, %s852_s5  ;;  %s856_s12 = sshll.u32 %s982_s6, 4  ;;  %s857_s12 = int_to_ptr.vmem [resolvable:$false] %s856_s12 }
 0x1c9   : > { %s858_s8 = scalar_lea.vmem %s857_s12, 256  ;;  %p859_p11 = scmp.lt.s32.totalorder %s508_s26, %s857_s12 }
 0x1ca   : > { %p854_p9 = pnand %p853_p8, %p1095_p12  ;;  %p860_p13 = scmp.lt.s32.totalorder %s858_s8, %s852_s5 }
 0x1cb   : > { %s505_s29 = scalar_lea.hbm %s1284_s16, %s653_s7 }
 0x1cc   : > { %p855_p10 = pneg %p854_p9  ;;  %p861_p0 = por %p860_p13, %p859_p11 }
 0x1ce   : > { %p862_p3 = pnand %p861_p0, %p855_p10 }
 0x1d0   : > { %865 = shalt.err (!%p862_p3)
}
 0x1d1   : > { %s866_s24 = scalar_lea.hbm %s505_s29, 128  ;;  %s870_s30 = scalar_lea.hbm %s1284_s16, 1024 }
 0x1d2   : > { %p867_p1 = scmp.ne.s32.totalorder %s505_s29, %s866_s24  ;;  %p871_p7 = scmp.lt.s32.totalorder %s505_s29, %s1284_s16 }
 0x1d3   : > { %p872_p6 = scmp.lt.s32.totalorder %s870_s30, %s866_s24 }
 0x1d4   : > { %p868_p5 = pnand %p867_p1, %p1095_p12 }
 0x1d5   : > { %p873_p8 = por %p872_p6, %p871_p7 }
 0x1d6   : > { %p869_p4 = pneg %p868_p5 }
 0x1d8   : > { %p874_p9 = pnand %p873_p8, %p869_p4 }
 0x1da   : > { %877 = shalt.err (!%p874_p9)
}
 0x1db   : > { %712 = dma.vmem_to_hbm [thread:$0]  (%p1095_p12), %s508_s26, 128, %s505_s29, %s492_s13  }
 0x1dc PF: > { %p723_p10 = scmp.ge.s32.totalorder %s972_s28, 2  ;;  %s519_s7 = sand.u32 1, %s932_s18  }
 0x1dd   : > { %s520_s9 = scalar_lea.sflag [#allocation4], %s519_s7 }
 0x1de   : > { %p719_p11 = pnand %p723_p10, %p1108_p2 }
 0x1e0   : > { %p720_p13 = pneg %p719_p11 }
 0x1e2   : > { %927 = dma.done.wait (%p720_p13), %s520_s9, 128  }
 0x1e3   : > { %929 = vsyncadd (%p720_p13), %s520_s9, 4294967168  ;;  %s21_s28 = sadd.s32 1, %s972_s28   ;;  %s1285_s15 = sld [smem:[#allocation12_spill]] }
 0x1e4   : > { %p18_p0 = scmp.ge.s32.totalorder %s21_s28, 10   ;;  %s1286_s24 = sld [smem:[#allocation8_spill]] }
 0x1e5   : > { %s1287_s25 = sld [smem:[#allocation9_spill]]  ;;  %s1290_s18 = smov %s936_s19 }
 0x1e6   : > { %s1288_s26 = sld [smem:[#allocation10_spill]]  ;;  %s1291_s19 = smov %s940_s20 }
 0x1e7   : > { %s1289_s27 = sld [smem:[#allocation11_spill]]  ;;  %s1292_s20 = smov %s1103_s17 }
 0x1e8   : > { %s1293_s21 = smov %s948_s22  ;;  %s1294_s22 = smov %s952_s23 }
 0x1e9   : > { %s1295_s23 = smov %s1285_s15  ;;  %20 = sbr.rel (!%p18_p0) target bundleno = 11 (0xb), region = 101 }
 0x1ee   :  { %525 = vsyncpa [#allocation3], 1 }
 0x1ef   :  { %527 = vsyncpa [#allocation3 + $0x1], 1 }
 0x1f0   :  { %528 = vsyncpa [#allocation4], 1 }
 0x1f1   :  { %530 = vsyncpa [#allocation4 + $0x1], 1 }

</bundles_post_ra>
